<compile_context>
chip_gen: v6e
topology: v6e:2x2x1
jax: 0.10.0
libtpu: 0.0.40
codegen_flags: <defaults>
</compile_context>

<pallas_src>
import functools
import math

import jax
import jax.numpy as jnp
import numpy as np
from jax import lax
from jax.experimental import pallas as pl
from jax.experimental.pallas import tpu as pltpu


# ----------------------------------------------------------------------------
# Host-side connectivity precompute (mirrors FlattenLoss.__init__ exactly).
# ----------------------------------------------------------------------------
def build_edge_indices(faces: np.ndarray):
    faces = np.asarray(faces, dtype=np.int64)
    vertices = list(
        set([tuple(v) for v in np.sort(np.concatenate((faces[:, 0:2], faces[:, 1:3]), axis=0))])
    )
    vert_face = {}
    for k, v in enumerate(faces):
        for vx in v:
            if vx not in vert_face.keys():
                vert_face[vx] = [k]
            else:
                vert_face[vx].append(k)
    v0s = np.array([v[0] for v in vertices], "int32")
    v1s = np.array([v[1] for v in vertices], "int32")
    v2s = []
    v3s = []
    idx = 0
    nosin_list = []
    for v0, v1 in zip(v0s, v1s):
        count = 0
        shared = sorted(list(set(vert_face[v0]) & set(vert_face[v1])))
        if len(shared) > 2:
            continue
        if len(shared) == 2:
            nosin_list.append(idx)
        for faceid in shared:
            face = faces[faceid]
            if v0 in face and v1 in face:
                v = np.copy(face)
                v = v[v != v0]
                v = v[v != v1]
                if count == 0:
                    v2s.append(int(v[0]))
                    count += 1
                else:
                    v3s.append(int(v[0]))
        idx += 1
    v2s = np.array(v2s, "int32")
    v3s = np.array(v3s, "int32")
    v0s = v0s[nosin_list]
    v1s = v1s[nosin_list]
    v2s = v2s[nosin_list]
    return v0s, v1s, v2s, v3s


def _round_up(x: int, m: int) -> int:
    return ((x + m - 1) // m) * m


def _tpu_vmem_capacity_bytes() -> int:
    try:
        return int(pltpu.get_tpu_info().vmem_capacity_bytes)
    except Exception:
        return 128 << 20  # conservative v5e/v6e-style default


def _default_num_partitions() -> int:
    # 2 TensorCores per chip only on v7x-class parts; otherwise the extra
    # partition just adds pad work / per-step overhead.
    try:
        kind = jax.devices()[0].device_kind.lower()
    except Exception:
        return 1
    return 2 if "v7" in kind else 1


# ----------------------------------------------------------------------------
# Pallas kernel: per-edge dihedral cosine + thresholded (cos+1)^2, accumulated
# into a per-core (tile_r, 128) output block (the output IS the accumulator).
# ----------------------------------------------------------------------------
def _flatten_loss_kernel(x_ref, out_ref, *, threshold, eps, n_edges, tile_r,
                         steps_per_part):
    j = pl.program_id(0)          # core / partition axis ("parallel")
    i = pl.program_id(1)          # reduction axis ("arbitrary")

    @pl.when(i == 0)
    def _():
        out_ref[...] = jnp.zeros_like(out_ref)

    # x_ref block: (9, tile_r, 128); rows 0-2 = a1, 3-5 = b1, 6-8 = b2.
    a1x, a1y, a1z = x_ref[0], x_ref[1], x_ref[2]
    b1x, b1y, b1z = x_ref[3], x_ref[4], x_ref[5]
    b2x, b2y, b2z = x_ref[6], x_ref[7], x_ref[8]

    # Component-wise dot products / norms (pure lane-wise VPU work, no XLU).
    a1l2 = a1x * a1x + a1y * a1y + a1z * a1z
    b1l2 = b1x * b1x + b1y * b1y + b1z * b1z
    b2l2 = b2x * b2x + b2y * b2y + b2z * b2z
    ab1 = a1x * b1x + a1y * b1y + a1z * b1z
    ab2 = a1x * b2x + a1y * b2y + a1z * b2z

    a1l1 = jnp.sqrt(a1l2 + eps)          # == a2l1 in the reference (a2 == a1)
    b1l1 = jnp.sqrt(b1l2 + eps)
    b2l1 = jnp.sqrt(b2l2 + eps)

    cos1 = ab1 / (a1l1 * b1l1 + eps)
    sin1 = jnp.sqrt(1.0 - cos1 * cos1 + eps)
    cos2 = ab2 / (a1l1 * b2l1 + eps)
    sin2 = jnp.sqrt(1.0 - cos2 * cos2 + eps)

    inv_a1l2 = 1.0 / (a1l2 + eps)
    s1 = ab1 * inv_a1l2
    s2 = ab2 * inv_a1l2
    cb1x = b1x - a1x * s1
    cb1y = b1y - a1y * s1
    cb1z = b1z - a1z * s1
    cb2x = b2x - a1x * s2
    cb2y = b2y - a1y * s2
    cb2z = b2z - a1z * s2

    num = cb1x * cb2x + cb1y * cb2y + cb1z * cb2z
    cb1l1 = b1l1 * sin1
    cb2l1 = b2l1 * sin2
    cosd = num / (cb1l1 * cb2l1 + eps)
    cosd = jnp.where(cosd > threshold, jnp.float32(-1.0), cosd)
    contrib = (cosd + 1.0) * (cosd + 1.0)

    # Mask only the block(s) that straddle / exceed the true edge count: the
    # padded lanes would otherwise contribute (0+1)^2 = 1 each. Interior blocks
    # skip the ~7 extra VALU ops per element.
    block_row0 = (j * steps_per_part + i) * tile_r
    needs_mask = (block_row0 + tile_r) * 128 > n_edges

    @pl.when(needs_mask)
    def _():
        row = lax.broadcasted_iota(jnp.int32, (tile_r, 128), 0)
        lane = lax.broadcasted_iota(jnp.int32, (tile_r, 128), 1)
        gidx = (block_row0 + row) * 128 + lane
        out_ref[0] = out_ref[0] + jnp.where(gidx < n_edges, contrib,
                                            jnp.float32(0.0))

    @pl.when(jnp.logical_not(needs_mask))
    def _():
        out_ref[0] = out_ref[0] + contrib


def flatten_loss_pallas(vertices, v0s, v1s, v2s, v3s, *, threshold_deg=0.0,
                        average=False, eps=1e-6, max_tile_r=None,
                        num_partitions=None, vmem_limit_bytes=None):
    """vertices: (V, 3) float32; returns loss of shape (1,) (batch of 1),
    or a scalar if average=True (matches the PyTorch module)."""
    vertices = vertices.astype(jnp.float32)
    E = int(v0s.shape[0])

    P = _default_num_partitions() if num_partitions is None else int(num_partitions)
    P = max(1, P)

    # ---- VMEM-aware tile sizing --------------------------------------------
    # Per 128-lane row of a tile (f32): 2x double-buffered 9-row input,
    # double-buffered output accumulator block, ~26 live element-wise
    # intermediates Mosaic will hold in VMEM.
    vmem_cap = _tpu_vmem_capacity_bytes()
    if vmem_limit_bytes is None:
        vmem_limit_bytes = int(min(vmem_cap * 3 // 4, 96 << 20))
    per_row_bytes = (2 * 9 + 2 + 26) * 128 * 4          # ~23 KiB / row
    budget = min(int(vmem_limit_bytes) // 2, 24 << 20)
    fit_r = max(8, (budget // per_row_bytes) // 8 * 8)
    cap_r = int(max_tile_r) if max_tile_r is not None else 512
    cap_r = max(8, min(cap_r, fit_r))

    # Edges folded into (rows, 128); tile_r rows per grid step.
    R = max(1, -(-E // 128))                             # rows of 128 edges
    tile_r = min(cap_r, _round_up(-(-R // P), 8))
    tile_r = _round_up(tile_r, 8)
    R_pad = _round_up(R, P * tile_r)
    S = R_pad // (P * tile_r)                            # grid steps / partition
    E_pad = R_pad * 128

    # ---- Lane-dense gather + pack (no (E,3) gather, no minor-dim transpose) -
    vT = vertices.T                                      # (3, V); V on lane axis
    V0 = jnp.take(vT, v0s, axis=1)                       # (3, E)
    a1 = jnp.take(vT, v1s, axis=1) - V0                  # rows 0-2
    b1 = jnp.take(vT, v2s, axis=1) - V0                  # rows 3-5
    b2 = jnp.take(vT, v3s, axis=1) - V0                  # rows 6-8
    X = jnp.concatenate([a1, b1, b2], axis=0)            # (9, E)
    Xp = jnp.pad(X, ((0, 0), (0, E_pad - E))).reshape(9, R_pad, 128)

    kernel = functools.partial(
        _flatten_loss_kernel,
        threshold=float(math.cos(threshold_deg * math.pi / 180.0)),
        eps=float(eps), n_edges=E, tile_r=tile_r, steps_per_part=S)

    partial_sums = pl.pallas_call(
        kernel,
        out_shape=jax.ShapeDtypeStruct((P, tile_r, 128), jnp.float32),
        grid_spec=pltpu.PrefetchScalarGridSpec(
            num_scalar_prefetch=0,
            grid=(P, S),
            in_specs=[pl.BlockSpec((9, tile_r, 128),
                                   lambda j, i: (0, j * S + i, 0))],
            out_specs=pl.BlockSpec((1, tile_r, 128),
                                   lambda j, i: (j, 0, 0)),
        ),
        compiler_params=pltpu.CompilerParams(
            dimension_semantics=("parallel", "arbitrary"),
            vmem_limit_bytes=int(vmem_limit_bytes)),
    )(Xp)

    loss = jnp.sum(partial_sums)     # tiny final reduce in XLA
    if average:
        return loss / 1.0            # batch_size = 1 (vertices.unsqueeze(0))
    return loss.reshape((1,))


# ----------------------------------------------------------------------------
# Pure-JAX reference (mirrors FlattenLoss.forward) for correctness check.
# ----------------------------------------------------------------------------
def flatten_loss_ref(vertices, v0s, v1s, v2s, v3s, threshold_deg=0.0, eps=1e-6):
    v = vertices.astype(jnp.float32)[None]  # (1, V, 3)
    V0 = v[:, v0s, :]
    V1 = v[:, v1s, :]
    V2 = v[:, v2s, :]
    V3 = v[:, v3s, :]
    a1 = V1 - V0
    b1 = V2 - V0
    a1l2 = jnp.sum(a1 ** 2, -1)
    b1l2 = jnp.sum(b1 ** 2, -1)
    a1l1 = jnp.sqrt(a1l2 + eps)
    b1l1 = jnp.sqrt(b1l2 + eps)
    ab1 = jnp.sum(a1 * b1, -1)
    cos1 = ab1 / (a1l1 * b1l1 + eps)
    sin1 = jnp.sqrt(1 - cos1 ** 2 + eps)
    c1 = a1 * (ab1 / (a1l2 + eps))[:, :, None]
    cb1 = b1 - c1
    cb1l1 = b1l1 * sin1
    a2 = V1 - V0
    b2 = V3 - V0
    a2l2 = jnp.sum(a2 ** 2, -1)
    b2l2 = jnp.sum(b2 ** 2, -1)
    a2l1 = jnp.sqrt(a2l2 + eps)
    b2l1 = jnp.sqrt(b2l2 + eps)
    ab2 = jnp.sum(a2 * b2, -1)
    cos2 = ab2 / (a2l1 * b2l1 + eps)
    sin2 = jnp.sqrt(1 - cos2 ** 2 + eps)
    c2 = a2 * (ab2 / (a2l2 + eps))[:, :, None]
    cb2 = b2 - c2
    cb2l1 = b2l1 * sin2
    cos = jnp.sum(cb1 * cb2, -1) / (cb1l1 * cb2l1 + eps)
    threshold = math.cos(threshold_deg * math.pi / 180.0)
    cos = jnp.where(cos > threshold, -1.0, cos)
    return jnp.sum((cos + 1) ** 2, axis=1)  # shape (1,)


# ----------------------------------------------------------------------------
def _make_grid_mesh(n, z_scale, key):
    """Triangulated (n+1)x(n+1) grid mesh with random z perturbation."""
    nv = (n + 1) * (n + 1)
    faces_list = []
    for r in range(n):
        for c in range(n):
            a = r * (n + 1) + c
            b = a + 1
            cidx = a + (n + 1)
            d = cidx + 1
            faces_list.append([a, b, cidx])
            faces_list.append([b, d, cidx])
    faces = np.array(faces_list, dtype=np.int64)
    xy = np.stack(np.meshgrid(np.arange(n + 1, dtype=np.float32),
                              np.arange(n + 1, dtype=np.float32),
                              indexing="ij"), axis=-1).reshape(nv, 2)
    z = z_scale * jax.random.normal(key, (nv, 1), dtype=jnp.float32)
    vertices = jnp.concatenate([jnp.asarray(xy), z], axis=-1)
    return vertices, faces


if __name__ == "__main__":
    key = jax.random.PRNGKey(0)
    k1, k2 = jax.random.split(key)

    # --- Test 1: small 4x4 grid mesh (single grid step, mask path). ---------
    vertices, faces = _make_grid_mesh(4, 0.3, k1)
    v0s_np, v1s_np, v2s_np, v3s_np = build_edge_indices(faces)
    v0s = jnp.asarray(v0s_np, jnp.int32)
    v1s = jnp.asarray(v1s_np, jnp.int32)
    v2s = jnp.asarray(v2s_np, jnp.int32)
    v3s = jnp.asarray(v3s_np, jnp.int32)

    loss = flatten_loss_pallas(vertices, v0s, v1s, v2s, v3s,
                               threshold_deg=0.0, average=False)
    loss = jax.block_until_ready(loss)
    loss_ref = flatten_loss_ref(vertices, v0s, v1s, v2s, v3s, threshold_deg=0.0)
    np.testing.assert_allclose(np.asarray(loss), np.asarray(loss_ref),
                               rtol=1e-3, atol=1e-3)

    # --- Test 2: larger 32x32 grid mesh, small tiles + 2 partitions forced so
    #     the multi-step accumulator path, both partitions, and both the masked
    #     and unmasked pl.when branches are exercised. ------------------------
    vertices2, faces2 = _make_grid_mesh(32, 0.2, k2)
    e0, e1, e2, e3 = build_edge_indices(faces2)
    e0 = jnp.asarray(e0, jnp.int32)
    e1 = jnp.asarray(e1, jnp.int32)
    e2 = jnp.asarray(e2, jnp.int32)
    e3 = jnp.asarray(e3, jnp.int32)

    loss2 = flatten_loss_pallas(vertices2, e0, e1, e2, e3, threshold_deg=0.0,
                                average=False, max_tile_r=8, num_partitions=2)
    loss2 = jax.block_until_ready(loss2)
    loss2_ref = flatten_loss_ref(vertices2, e0, e1, e2, e3, threshold_deg=0.0)
    np.testing.assert_allclose(np.asarray(loss2), np.asarray(loss2_ref),
                               rtol=1e-3, atol=1e-3)

    # Default (auto-sized large tile, auto partitions) config on the bigger mesh.
    loss3 = flatten_loss_pallas(vertices2, e0, e1, e2, e3, threshold_deg=0.0)
    loss3 = jax.block_until_ready(loss3)
    np.testing.assert_allclose(np.asarray(loss3), np.asarray(loss2_ref),
                               rtol=1e-3, atol=1e-3)

    # average=True path (scalar, batch_size = 1).
    loss4 = flatten_loss_pallas(vertices2, e0, e1, e2, e3, threshold_deg=0.0,
                                average=True)
    loss4 = jax.block_until_ready(loss4)
    np.testing.assert_allclose(np.asarray(loss4), np.asarray(loss2_ref).sum(),
                               rtol=1e-3, atol=1e-3)

    print("KERNEL_OK")
</pallas_src>

<mosaic_0001>
module attributes {stable_mosaic.version = 11 : i64} {
  func.func @_flatten_loss_kernel(%arg0: i32, %arg1: i32, %arg2: memref<9x8x128xf32, #tpu.memory_space<vmem>>, %arg3: memref<1x8x128xf32, #tpu.memory_space<vmem>>) attributes {dimension_semantics = [#tpu.dimension_semantics<parallel>, #tpu.dimension_semantics<arbitrary>], iteration_bounds = array<i64: 1, 1>, scalar_prefetch = 0 : i64, scratch_operands = 0 : i64, tpu.core_type = #tpu.core_type<tc>, window_params = [{transform_indices = @transform_0, window_bounds = array<i64: 9, 8, 128>}, {transform_indices = @transform_1, window_bounds = array<i64: 1, 8, 128>}]} {
    %c0_i32 = arith.constant 0 : i32
    %0 = arith.cmpi eq, %arg1, %c0_i32 : i32
    %1 = arith.extui %0 : i1 to i32
    %c0_i32_0 = arith.constant 0 : i32
    %2 = arith.cmpi ne, %1, %c0_i32_0 : i32
    scf.if %2 {
      %cst_37 = arith.constant 0.000000e+00 : f32
      %124 = vector.broadcast %cst_37 : f32 to vector<1x8x128xf32>
      %c0_38 = arith.constant 0 : index
      %c0_39 = arith.constant 0 : index
      %c0_40 = arith.constant 0 : index
      %125 = vector.load %arg3[%c0_38, %c0_39, %c0_40] : memref<1x8x128xf32, #tpu.memory_space<vmem>>, vector<1x8x128xf32>
      tpu.vector_store %arg3[%c0_38, %c0_39, %c0_40], %124 {strides = array<i32>} : memref<1x8x128xf32, #tpu.memory_space<vmem>>, vector<1x8x128xf32>,
    } else {
    }
    %c0 = arith.constant 0 : index
    %c0_1 = arith.constant 0 : index
    %c0_2 = arith.constant 0 : index
    %3 = vector.load %arg2[%c0, %c0_1, %c0_2] : memref<9x8x128xf32, #tpu.memory_space<vmem>>, vector<1x8x128xf32>
    %4 = vector.shape_cast %3 : vector<1x8x128xf32> to vector<8x128xf32>
    %c1 = arith.constant 1 : index
    %c0_3 = arith.constant 0 : index
    %c0_4 = arith.constant 0 : index
    %5 = vector.load %arg2[%c1, %c0_3, %c0_4] : memref<9x8x128xf32, #tpu.memory_space<vmem>>, vector<1x8x128xf32>
    %6 = vector.shape_cast %5 : vector<1x8x128xf32> to vector<8x128xf32>
    %c2 = arith.constant 2 : index
    %c0_5 = arith.constant 0 : index
    %c0_6 = arith.constant 0 : index
    %7 = vector.load %arg2[%c2, %c0_5, %c0_6] : memref<9x8x128xf32, #tpu.memory_space<vmem>>, vector<1x8x128xf32>
    %8 = vector.shape_cast %7 : vector<1x8x128xf32> to vector<8x128xf32>
    %c3 = arith.constant 3 : index
    %c0_7 = arith.constant 0 : index
    %c0_8 = arith.constant 0 : index
    %9 = vector.load %arg2[%c3, %c0_7, %c0_8] : memref<9x8x128xf32, #tpu.memory_space<vmem>>, vector<1x8x128xf32>
    %10 = vector.shape_cast %9 : vector<1x8x128xf32> to vector<8x128xf32>
    %c4 = arith.constant 4 : index
    %c0_9 = arith.constant 0 : index
    %c0_10 = arith.constant 0 : index
    %11 = vector.load %arg2[%c4, %c0_9, %c0_10] : memref<9x8x128xf32, #tpu.memory_space<vmem>>, vector<1x8x128xf32>
    %12 = vector.shape_cast %11 : vector<1x8x128xf32> to vector<8x128xf32>
    %c5 = arith.constant 5 : index
    %c0_11 = arith.constant 0 : index
    %c0_12 = arith.constant 0 : index
    %13 = vector.load %arg2[%c5, %c0_11, %c0_12] : memref<9x8x128xf32, #tpu.memory_space<vmem>>, vector<1x8x128xf32>
    %14 = vector.shape_cast %13 : vector<1x8x128xf32> to vector<8x128xf32>
    %c6 = arith.constant 6 : index
    %c0_13 = arith.constant 0 : index
    %c0_14 = arith.constant 0 : index
    %15 = vector.load %arg2[%c6, %c0_13, %c0_14] : memref<9x8x128xf32, #tpu.memory_space<vmem>>, vector<1x8x128xf32>
    %16 = vector.shape_cast %15 : vector<1x8x128xf32> to vector<8x128xf32>
    %c7 = arith.constant 7 : index
    %c0_15 = arith.constant 0 : index
    %c0_16 = arith.constant 0 : index
    %17 = vector.load %arg2[%c7, %c0_15, %c0_16] : memref<9x8x128xf32, #tpu.memory_space<vmem>>, vector<1x8x128xf32>
    %18 = vector.shape_cast %17 : vector<1x8x128xf32> to vector<8x128xf32>
    %c8 = arith.constant 8 : index
    %c0_17 = arith.constant 0 : index
    %c0_18 = arith.constant 0 : index
    %19 = vector.load %arg2[%c8, %c0_17, %c0_18] : memref<9x8x128xf32, #tpu.memory_space<vmem>>, vector<1x8x128xf32>
    %20 = vector.shape_cast %19 : vector<1x8x128xf32> to vector<8x128xf32>
    %21 = arith.mulf %4, %4 : vector<8x128xf32>
    %22 = arith.mulf %6, %6 : vector<8x128xf32>
    %23 = arith.addf %21, %22 : vector<8x128xf32>
    %24 = arith.mulf %8, %8 : vector<8x128xf32>
    %25 = arith.addf %23, %24 : vector<8x128xf32>
    %26 = arith.mulf %10, %10 : vector<8x128xf32>
    %27 = arith.mulf %12, %12 : vector<8x128xf32>
    %28 = arith.addf %26, %27 : vector<8x128xf32>
    %29 = arith.mulf %14, %14 : vector<8x128xf32>
    %30 = arith.addf %28, %29 : vector<8x128xf32>
    %31 = arith.mulf %16, %16 : vector<8x128xf32>
    %32 = arith.mulf %18, %18 : vector<8x128xf32>
    %33 = arith.addf %31, %32 : vector<8x128xf32>
    %34 = arith.mulf %20, %20 : vector<8x128xf32>
    %35 = arith.addf %33, %34 : vector<8x128xf32>
    %36 = arith.mulf %4, %10 : vector<8x128xf32>
    %37 = arith.mulf %6, %12 : vector<8x128xf32>
    %38 = arith.addf %36, %37 : vector<8x128xf32>
    %39 = arith.mulf %8, %14 : vector<8x128xf32>
    %40 = arith.addf %38, %39 : vector<8x128xf32>
    %41 = arith.mulf %4, %16 : vector<8x128xf32>
    %42 = arith.mulf %6, %18 : vector<8x128xf32>
    %43 = arith.addf %41, %42 : vector<8x128xf32>
    %44 = arith.mulf %8, %20 : vector<8x128xf32>
    %45 = arith.addf %43, %44 : vector<8x128xf32>
    %cst = arith.constant 9.99999997E-7 : f32
    %46 = vector.broadcast %cst : f32 to vector<8x128xf32>
    %47 = arith.addf %25, %46 : vector<8x128xf32>
    %48 = math.sqrt %47 : vector<8x128xf32>
    %cst_19 = arith.constant 9.99999997E-7 : f32
    %49 = vector.broadcast %cst_19 : f32 to vector<8x128xf32>
    %50 = arith.addf %30, %49 : vector<8x128xf32>
    %51 = math.sqrt %50 : vector<8x128xf32>
    %cst_20 = arith.constant 9.99999997E-7 : f32
    %52 = vector.broadcast %cst_20 : f32 to vector<8x128xf32>
    %53 = arith.addf %35, %52 : vector<8x128xf32>
    %54 = math.sqrt %53 : vector<8x128xf32>
    %55 = arith.mulf %48, %51 : vector<8x128xf32>
    %cst_21 = arith.constant 9.99999997E-7 : f32
    %56 = vector.broadcast %cst_21 : f32 to vector<8x128xf32>
    %57 = arith.addf %55, %56 : vector<8x128xf32>
    %58 = arith.divf %40, %57 : vector<8x128xf32>
    %59 = arith.mulf %58, %58 : vector<8x128xf32>
    %cst_22 = arith.constant 1.000000e+00 : f32
    %60 = vector.broadcast %cst_22 : f32 to vector<8x128xf32>
    %61 = arith.subf %60, %59 : vector<8x128xf32>
    %cst_23 = arith.constant 9.99999997E-7 : f32
    %62 = vector.broadcast %cst_23 : f32 to vector<8x128xf32>
    %63 = arith.addf %61, %62 : vector<8x128xf32>
    %64 = math.sqrt %63 : vector<8x128xf32>
    %65 = arith.mulf %48, %54 : vector<8x128xf32>
    %cst_24 = arith.constant 9.99999997E-7 : f32
    %66 = vector.broadcast %cst_24 : f32 to vector<8x128xf32>
    %67 = arith.addf %65, %66 : vector<8x128xf32>
    %68 = arith.divf %45, %67 : vector<8x128xf32>
    %69 = arith.mulf %68, %68 : vector<8x128xf32>
    %cst_25 = arith.constant 1.000000e+00 : f32
    %70 = vector.broadcast %cst_25 : f32 to vector<8x128xf32>
    %71 = arith.subf %70, %69 : vector<8x128xf32>
    %cst_26 = arith.constant 9.99999997E-7 : f32
    %72 = vector.broadcast %cst_26 : f32 to vector<8x128xf32>
    %73 = arith.addf %71, %72 : vector<8x128xf32>
    %74 = math.sqrt %73 : vector<8x128xf32>
    %cst_27 = arith.constant 9.99999997E-7 : f32
    %75 = vector.broadcast %cst_27 : f32 to vector<8x128xf32>
    %76 = arith.addf %25, %75 : vector<8x128xf32>
    %cst_28 = arith.constant 1.000000e+00 : f32
    %77 = vector.broadcast %cst_28 : f32 to vector<8x128xf32>
    %78 = arith.divf %77, %76 : vector<8x128xf32>
    %79 = arith.mulf %40, %78 : vector<8x128xf32>
    %80 = arith.mulf %45, %78 : vector<8x128xf32>
    %81 = arith.mulf %4, %79 : vector<8x128xf32>
    %82 = arith.subf %10, %81 : vector<8x128xf32>
    %83 = arith.mulf %6, %79 : vector<8x128xf32>
    %84 = arith.subf %12, %83 : vector<8x128xf32>
    %85 = arith.mulf %8, %79 : vector<8x128xf32>
    %86 = arith.subf %14, %85 : vector<8x128xf32>
    %87 = arith.mulf %4, %80 : vector<8x128xf32>
    %88 = arith.subf %16, %87 : vector<8x128xf32>
    %89 = arith.mulf %6, %80 : vector<8x128xf32>
    %90 = arith.subf %18, %89 : vector<8x128xf32>
    %91 = arith.mulf %8, %80 : vector<8x128xf32>
    %92 = arith.subf %20, %91 : vector<8x128xf32>
    %93 = arith.mulf %82, %88 : vector<8x128xf32>
    %94 = arith.mulf %84, %90 : vector<8x128xf32>
    %95 = arith.addf %93, %94 : vector<8x128xf32>
    %96 = arith.mulf %86, %92 : vector<8x128xf32>
    %97 = arith.addf %95, %96 : vector<8x128xf32>
    %98 = arith.mulf %51, %64 : vector<8x128xf32>
    %99 = arith.mulf %54, %74 : vector<8x128xf32>
    %100 = arith.mulf %98, %99 : vector<8x128xf32>
    %cst_29 = arith.constant 9.99999997E-7 : f32
    %101 = vector.broadcast %cst_29 : f32 to vector<8x128xf32>
    %102 = arith.addf %100, %101 : vector<8x128xf32>
    %103 = arith.divf %97, %102 : vector<8x128xf32>
    %cst_30 = arith.constant 1.000000e+00 : f32
    %104 = vector.broadcast %cst_30 : f32 to vector<8x128xf32>
    %105 = arith.cmpf ogt, %103, %104 : vector<8x128xf32>
    %cst_31 = arith.constant -1.000000e+00 : f32
    %106 = vector.broadcast %cst_31 : f32 to vector<8x128xf32>
    %107 = arith.select %105, %106, %103 : vector<8x128xi1>, vector<8x128xf32>
    %cst_32 = arith.constant 1.000000e+00 : f32
    %108 = vector.broadcast %cst_32 : f32 to vector<8x128xf32>
    %109 = arith.addf %107, %108 : vector<8x128xf32>
    %cst_33 = arith.constant 1.000000e+00 : f32
    %110 = vector.broadcast %cst_33 : f32 to vector<8x128xf32>
    %111 = arith.addf %107, %110 : vector<8x128xf32>
    %112 = arith.mulf %109, %111 : vector<8x128xf32>
    %c1_i32 = arith.constant 1 : i32
    %113 = arith.muli %arg0, %c1_i32 : i32
    %114 = arith.addi %113, %arg1 : i32
    %c8_i32 = arith.constant 8 : i32
    %115 = arith.muli %114, %c8_i32 : i32
    %c8_i32_34 = arith.constant 8 : i32
    %116 = arith.addi %115, %c8_i32_34 : i32
    %c128_i32 = arith.constant 128 : i32
    %117 = arith.muli %116, %c128_i32 : i32
    %c40_i32 = arith.constant 40 : i32
    %118 = arith.cmpi sgt, %117, %c40_i32 : i32
    %119 = arith.extui %118 : i1 to i32
    %c0_i32_35 = arith.constant 0 : i32
    %120 = arith.cmpi ne, %119, %c0_i32_35 : i32
    scf.if %120 {
      %124 = tpu.iota {dimensions = array<i32: 0>} : vector<8x128xi32>
      %125 = tpu.iota {dimensions = array<i32: 1>} : vector<8x128xi32>
      %126 = vector.broadcast %115 : i32 to vector<8x128xi32>
      %127 = arith.addi %126, %124 : vector<8x128xi32>
      %c128_i32_37 = arith.constant 128 : i32
      %128 = vector.broadcast %c128_i32_37 : i32 to vector<8x128xi32>
      %129 = arith.muli %127, %128 : vector<8x128xi32>
      %130 = arith.addi %129, %125 : vector<8x128xi32>
      %c0_38 = arith.constant 0 : index
      %c0_39 = arith.constant 0 : index
      %c0_40 = arith.constant 0 : index
      %131 = vector.load %arg3[%c0_38, %c0_39, %c0_40] : memref<1x8x128xf32, #tpu.memory_space<vmem>>, vector<1x8x128xf32>
      %132 = vector.shape_cast %131 : vector<1x8x128xf32> to vector<8x128xf32>
      %c40_i32_41 = arith.constant 40 : i32
      %133 = vector.broadcast %c40_i32_41 : i32 to vector<8x128xi32>
      %134 = arith.cmpi slt, %130, %133 : vector<8x128xi32>
      %cst_42 = arith.constant 0.000000e+00 : f32
      %135 = vector.broadcast %cst_42 : f32 to vector<8x128xf32>
      %136 = arith.select %134, %112, %135 : vector<8x128xi1>, vector<8x128xf32>
      %137 = arith.addf %132, %136 : vector<8x128xf32>
      %c0_43 = arith.constant 0 : index
      %c0_44 = arith.constant 0 : index
      %c0_45 = arith.constant 0 : index
      %138 = vector.load %arg3[%c0_43, %c0_44, %c0_45] : memref<1x8x128xf32, #tpu.memory_space<vmem>>, vector<1x8x128xf32>
      %139 = vector.shape_cast %138 : vector<1x8x128xf32> to vector<8x128xf32>
      %140 = vector.shape_cast %137 : vector<8x128xf32> to vector<1x8x128xf32>
      tpu.vector_store %arg3[%c0_43, %c0_44, %c0_45], %140 {strides = array<i32>} : memref<1x8x128xf32, #tpu.memory_space<vmem>>, vector<1x8x128xf32>,
    } else {
    }
    %true = arith.constant true
    %121 = arith.xori %118, %true : i1
    %122 = arith.extui %121 : i1 to i32
    %c0_i32_36 = arith.constant 0 : i32
    %123 = arith.cmpi ne, %122, %c0_i32_36 : i32
    scf.if %123 {
      %c0_37 = arith.constant 0 : index
      %c0_38 = arith.constant 0 : index
      %c0_39 = arith.constant 0 : index
      %124 = vector.load %arg3[%c0_37, %c0_38, %c0_39] : memref<1x8x128xf32, #tpu.memory_space<vmem>>, vector<1x8x128xf32>
      %125 = vector.shape_cast %124 : vector<1x8x128xf32> to vector<8x128xf32>
      %126 = arith.addf %125, %112 : vector<8x128xf32>
      %c0_40 = arith.constant 0 : index
      %c0_41 = arith.constant 0 : index
      %c0_42 = arith.constant 0 : index
      %127 = vector.load %arg3[%c0_40, %c0_41, %c0_42] : memref<1x8x128xf32, #tpu.memory_space<vmem>>, vector<1x8x128xf32>
      %128 = vector.shape_cast %127 : vector<1x8x128xf32> to vector<8x128xf32>
      %129 = vector.shape_cast %126 : vector<8x128xf32> to vector<1x8x128xf32>
      tpu.vector_store %arg3[%c0_40, %c0_41, %c0_42], %129 {strides = array<i32>} : memref<1x8x128xf32, #tpu.memory_space<vmem>>, vector<1x8x128xf32>,
    } else {
    }
    return
  }
  func.func @transform_0(%arg0: i32, %arg1: i32) -> (i32, i32, i32) {
    %c1_i32 = arith.constant 1 : i32
    %0 = arith.muli %arg0, %c1_i32 : i32
    %1 = arith.addi %0, %arg1 : i32
    %c0_i32 = arith.constant 0 : i32
    %c0_i32_0 = arith.constant 0 : i32
    %c0_i32_1 = arith.constant 0 : i32
    return %c0_i32, %1, %c0_i32_0 : i32, i32, i32
  }
  func.func @transform_1(%arg0: i32, %arg1: i32) -> (i32, i32, i32) {
    %c0_i32 = arith.constant 0 : i32
    %c0_i32_0 = arith.constant 0 : i32
    %c0_i32_1 = arith.constant 0 : i32
    return %arg0, %c0_i32, %c0_i32_0 : i32, i32, i32
  }
}

</mosaic_0001>

<bundles_post_ra>
// kernel: tpu_custom_call.1
= control target key start
LH: loop header
LB: loop body
LE: loop exit
PB: predicated region body
PF: predicated region fallthrough
CT: control target
= control target key end

     0   :  { %6 = vsyncpa [#allocation3], 0  ;;  %s348_s0 = inlined_call_operand.hbm [shape: f32[9,8,128], index: 0, kind: input, shape index: {}]   ;;  %s349_s1 = inlined_call_operand.hbm [shape: f32[1,8,128], index: 1, kind: output, shape index: {}]  }
   0x1   :  { %7 = vsyncpa [#allocation4], 0  ;;  %s267_s6 = smov [#allocation2]  }
   0x2   :  { %s16_s7 = sshll.u32 %s267_s6, 4  ;;  %s17_s7 = int_to_ptr.vmem [resolvable:$true] %s16_s7 }
   0x3   :  { %s231_s8 = scalar_lea.vmem %s17_s7, 1152  ;;  %p236_p1 = scmp.lt.s32.totalorder %s17_s7, %s17_s7 }
   0x4   :  { %p232_p0 = scmp.ne.s32.totalorder %s17_s7, %s231_s8  ;;  %p237_p2 = scmp.lt.s32.totalorder %s231_s8, %s231_s8 }
   0x6   :  { %p238_p3 = por %p237_p2, %p236_p1 }
   0x8   :  { %p239_p4 = pnand %p238_p3, %p232_p0 }
   0xa   :  { %242 = shalt.err (!%p239_p4)
}
   0xb   :  { %s268_s9 = smov 128   ;;  %s269_s10 = smov 8  }
   0xc   :  { %22 = dma.hbm_to_vmem [thread:$0]  %s348_s0, 1152, %s17_s7, [#allocation3], %s268_s9, %s268_s9, %s269_s10  }
   0xd   :  { %263 = dma.done.wait [#allocation3], 1152  }
   0xe   :  { %264 = vsyncadd [#allocation3], 4294966144  ;;  %v284_v0 = vld [vmem:[#allocation2] sm:$0xff]  ;;  %v286_v1 = vld [vmem:[#allocation2 + $0x8] sm:$0xff]  ;;  %s270_s0 = smov [#allocation5]  }
   0xf   :  { %v288_v2 = vld [vmem:[#allocation2 + $0x10] sm:$0xff]  ;;  %v290_v3 = vld [vmem:[#allocation2 + $0x18] sm:$0xff]  ;;  %v292_v4 = vld [vmem:[#allocation2 + $0x20] sm:$0xff]  ;;  %v49_v6 = vmul.f32 %v284_v0, %v284_v0  ;;  %v50_v7 = vmul.f32 %v286_v1, %v286_v1  ;;  %s191_s13 = sshll.u32 %s270_s0, 4  ;;  %s192_s13 = int_to_ptr.vmem [resolvable:$true] %s191_s13 }
  0x10   :  { %v294_v5 = vld [vmem:[#allocation2 + $0x28] sm:$0xff]  ;;  %v52_v8 = vmul.f32 %v288_v2, %v288_v2  ;;  %v302_v9 = vld [vmem:[#allocation2 + $0x30] sm:$0xff]  ;;  %v304_v10 = vld [vmem:[#allocation2 + $0x38] sm:$0xff]  ;;  %v54_v12 = vmul.f32 %v290_v3, %v290_v3  ;;  %v55_v13 = vmul.f32 %v292_v4, %v292_v4  ;;  %v64_v27 = vmul.f32 %v290_v3, %v284_v0  ;;  %s243_s14 = scalar_lea.vmem %s192_s13, 128  ;;  %p248_p6 = scmp.lt.s32.totalorder %s192_s13, %s192_s13 }
  0x11   :  { %v306_v11 = vld [vmem:[#allocation2 + $0x40] sm:$0xff]  ;;  %v57_v14 = vmul.f32 %v294_v5, %v294_v5  ;;  %v51_v15 = vadd.f32 %v50_v7, %v49_v6  ;;  %v59_v16 = vmul.f32 %v302_v9, %v302_v9  ;;  %v60_v17 = vmul.f32 %v304_v10, %v304_v10  ;;  %p244_p5 = scmp.ne.s32.totalorder %s192_s13, %s243_s14  ;;  %p249_p7 = scmp.lt.s32.totalorder %s243_s14, %s243_s14 }
  0x12   :  { %v62_v18 = vmul.f32 %v306_v11, %v306_v11  ;;  %v56_v19 = vadd.f32 %v55_v13, %v54_v12  ;;  %v65_v28 = vmul.f32 %v292_v4, %v286_v1  ;;  %v69_v29 = vmul.f32 %v302_v9, %v284_v0 }
  0x13   :  { %v53_v20 = vadd.f32 %v52_v8, %v51_v15  ;;  %v61_v21 = vadd.f32 %v60_v17, %v59_v16  ;;  %v70_v30 = vmul.f32 %v304_v10, %v286_v1  ;;  %v67_v32 = vmul.f32 %v294_v5, %v288_v2  ;;  %p250_p8 = por %p249_p7, %p248_p6 }
  0x14   :  { %v58_v22 = vadd.f32 %v57_v14, %v56_v19  ;;  %v66_v31 = vadd.f32 %v65_v28, %v64_v27  ;;  %v72_v34 = vmul.f32 %v306_v11, %v288_v2 }
  0x15   :  { %v63_v23 = vadd.f32 %v62_v18, %v61_v21  ;;  %v74_v24 = vadd.f32 1e-06, %v53_v20  ;;  %v71_v33 = vadd.f32 %v70_v30, %v69_v29  ;;  %p251_p9 = pnand %p250_p8, %p244_p5 }
  0x16   :  { %v82_v25 = vadd.f32 1e-06, %v58_v22  ;;  %v68_v36 = vadd.f32 %v67_v32, %v66_v31 }
  0x17   :  { %205 = vrsqrt.f32 %v74_v24  ;;  %v90_v26 = vadd.f32 1e-06, %v63_v23  ;;  %v73_v37 = vadd.f32 %v72_v34, %v71_v33  ;;  %vm77_vm0 = vcmp.eq.f32.partialorder %v74_v24, inf }
  0x18   :  { %207 = vrsqrt.f32 %v82_v25  ;;  %v80_v38 = vand.u32 2147483648, %v74_v24  ;;  %vm79_vm1 = vcmp.eq.f32.partialorder %v74_v24, 0.0  ;;  %vm85_vm2 = vcmp.eq.f32.partialorder %v82_v25, inf }
  0x19   :  { %209 = vrcp.f32 %v74_v24  ;;  %v88_v41 = vand.u32 2147483648, %v82_v25  ;;  %vm87_vm3 = vcmp.eq.f32.partialorder %v82_v25, 0.0  ;;  %vm93_vm4 = vcmp.eq.f32.partialorder %v90_v26, inf }
  0x1a   :  { %211 = vrsqrt.f32 %v90_v26  ;;  %vm95_vm5 = vcmp.eq.f32.partialorder %v90_v26, 0.0  ;;  %v96_v50 = vand.u32 2147483648, %v90_v26 }
  0x24   :  { %v206_v35 = vpop.eup %205 }
  0x25   :  { %v208_v39 = vpop.eup %207  ;;  %v76_v40 = vmul.f32 %v206_v35, %v74_v24 }
  0x26   :  { %v210_v42 = vpop.eup %209  ;;  %v84_v43 = vmul.f32 %v208_v39, %v82_v25 }
  0x27   :  { %v78_v44 = vsel %vm77_vm0, %v74_v24, %v76_v40  ;;  %v128_v45 = vmul.f32 %v210_v42, %v68_v36  ;;  %v129_v46 = vmul.f32 %v210_v42, %v73_v37  ;;  %v212_v47 = vpop.eup %211 }
  0x28   :  { %v81_v48 = vsel %vm79_vm1, %v80_v38, %v78_v44  ;;  %v86_v49 = vsel %vm85_vm2, %v82_v25, %v84_v43  ;;  %v92_v52 = vmul.f32 %v212_v47, %v90_v26 }
  0x29   :  { %v89_v51 = vsel %vm87_vm3, %v88_v41, %v86_v49  ;;  %v130_v53 = vmul.f32 %v128_v45, %v284_v0  ;;  %v132_v54 = vmul.f32 %v128_v45, %v286_v1  ;;  %v134_v56 = vmul.f32 %v128_v45, %v288_v2 }
  0x2a   :  { %v98_v55 = vmul.f32 %v89_v51, %v81_v48  ;;  %v136_v57 = vmul.f32 %v129_v46, %v284_v0  ;;  %v138_v58 = vmul.f32 %v129_v46, %v286_v1  ;;  %v94_v59 = vsel %vm93_vm4, %v90_v26, %v92_v52 }
  0x2b   :  { %v131_v60 = vsub.f32 %v290_v3, %v130_v53  ;;  %v133_v61 = vsub.f32 %v292_v4, %v132_v54  ;;  %v140_v62 = vmul.f32 %v129_v46, %v288_v2  ;;  %v97_v63 = vsel %vm95_vm5, %v96_v50, %v94_v59 }
  0x2c   :  { %v99_v6 = vadd.f32 1e-06, %v98_v55  ;;  %v135_v7 = vsub.f32 %v294_v5, %v134_v56  ;;  %v137_v8 = vsub.f32 %v302_v9, %v136_v57  ;;  %v112_v12 = vmul.f32 %v97_v63, %v81_v48 }
  0x2d   :  { %v139_v13 = vsub.f32 %v304_v10, %v138_v58  ;;  %v141_v0 = vsub.f32 %v306_v11, %v140_v62 }
  0x2e   :  { %213 = vrcp.f32 %v99_v6  ;;  %v142_v1 = vmul.f32 %v137_v8, %v131_v60  ;;  %v113_v14 = vadd.f32 1e-06, %v112_v12 }
  0x2f   :  { %v143_v15 = vmul.f32 %v139_v13, %v133_v61  ;;  %v145_v3 = vmul.f32 %v141_v0, %v135_v7 }
  0x30   :  { %215 = vrcp.f32 %v113_v14 }
  0x31   :  { %v144_v4 = vadd.f32 %v143_v15, %v142_v1 }
  0x33   :  { %v146_v16 = vadd.f32 %v145_v3, %v144_v4 }
  0x3b   :  { %v214_v2 = vpop.eup %213 }
  0x3c   :  { %v101_v17 = vmul.f32 %v214_v2, %v68_v36  ;;  %v165_v36 = vlaneseq }
  0x3d   :  { %v216_v18 = vpop.eup %215 }
  0x3e   :  { %v102_v19 = vmul.f32 %v101_v17, %v101_v17  ;;  %v115_v5 = vmul.f32 %v216_v18, %v73_v37  ;;  %v166_v37 = vshrl.u32 %v165_v36, 7  ;;  %v168_v38 = vand.u32 127, %v165_v36 }
  0x40   :  { %v103_v20 = vsub.f32 1.0, %v102_v19  ;;  %v116_v9 = vmul.f32 %v115_v5, %v115_v5  ;;  %v171_v39 = vmul.u32 128, %v166_v37 }
  0x42   :  { %v104_v21 = vadd.f32 1e-06, %v103_v20  ;;  %v117_v22 = vsub.f32 1.0, %v116_v9  ;;  %v172_v42 = vadd.s32 %v171_v39, %v168_v38 }
  0x44   :  { %217 = vrsqrt.f32 %v104_v21  ;;  %v118_v10 = vadd.f32 1e-06, %v117_v22  ;;  %vm107_vm6 = vcmp.eq.f32.partialorder %v104_v21, inf  ;;  %v110_v23 = vand.u32 2147483648, %v104_v21 }
  0x45   :  { %vm109_vm7 = vcmp.eq.f32.partialorder %v104_v21, 0.0  ;;  %vm174_vm11 = vcmp.lt.s32.totalorder %v172_v42, 40 }
  0x46   :  { %219 = vrsqrt.f32 %v118_v10  ;;  %vm121_vm8 = vcmp.eq.f32.partialorder %v118_v10, inf  ;;  %v124_v27 = vand.u32 2147483648, %v118_v10  ;;  %vm123_vm9 = vcmp.eq.f32.partialorder %v118_v10, 0.0 }
  0x51   :  { %v218_v11 = vpop.eup %217 }
  0x52   :  { %v106_v24 = vmul.f32 %v218_v11, %v104_v21 }
  0x53   :  { %v220_v25 = vpop.eup %219 }
  0x54   :  { %v108_v26 = vsel %vm107_vm6, %v104_v21, %v106_v24  ;;  %v120_v29 = vmul.f32 %v220_v25, %v118_v10 }
  0x55   :  { %v111_v28 = vsel %vm109_vm7, %v110_v23, %v108_v26 }
  0x56   :  { %v122_v30 = vsel %vm121_vm8, %v118_v10, %v120_v29  ;;  %v147_v31 = vmul.f32 %v111_v28, %v89_v51 }
  0x57   :  { %v125_v32 = vsel %vm123_vm9, %v124_v27, %v122_v30 }
  0x58   :  { %v148_v33 = vmul.f32 %v125_v32, %v97_v63 }
  0x5a   :  { %v149_v34 = vmul.f32 %v148_v33, %v147_v31 }
  0x5c   :  { %v150_v35 = vadd.f32 1e-06, %v149_v34 }
  0x5e   :  { %221 = vrcp.f32 %v150_v35 }
  0x6b   :  { %v222_v40 = vpop.eup %221 }
  0x6c   :  { %v152_v41 = vmul.f32 %v222_v40, %v146_v16 }
  0x6e   :  { %vm153_vm10 = vcmp.gt.f32.partialorder %v152_v41, 1.0 }
  0x6f   :  { %v154_v43 = vsel %vm153_vm10, -1.0, %v152_v41 }
  0x70   :  { %v155_v44 = vadd.f32 1.0, %v154_v43 }
  0x72   :  { %v156_v45 = vmul.f32 %v155_v44, %v155_v44 }
  0x74   :  { %v175_v46 = vsel %vm174_vm11, %v156_v45, 0.0 }
  0x75   :  { %177 = vst [vmem:[#allocation5] sm:$0xff] %v175_v46 }
  0x76   :  { %254 = shalt.err (!%p251_p9)
}
  0x77   :  { %194 = dma.vmem_to_hbm [thread:$0]  %s192_s13, 128, %s349_s1, [#allocation4]  }
  0x78   :  { %265 = dma.done.wait [#allocation4], 128  }
  0x79   :  { %266 = vsyncadd [#allocation4], 4294967168 }
  0x7a   :  { %198 = vsyncpa [#allocation3], 1 }
  0x7b   :  { %199 = vsyncpa [#allocation4], 1 }

</bundles_post_ra>
